<compile_context>
chip_gen: v5e
topology: v5e:2x2
jax: 0.10.0
libtpu: 0.0.40
codegen_flags: <defaults>
</compile_context>

<pallas_src>
import jax
import jax.numpy as jnp
from jax.experimental import pallas as pl
from jax.experimental.pallas import tpu as pltpu


def _round_up(x, m):
    return (x + m - 1) // m * m


def _pick_block_n(n, seg_rows, max_rows=2048, max_nb=256):
    """Batch-tile size: as big as the row budget allows; prefer an exact
    divisor of n (no padded batches) when one close to the cap exists."""
    cap = max(1, min(max_nb, max_rows // seg_rows, n))
    best_div = 1
    for d in range(1, cap + 1):
        if n % d == 0:
            best_div = d
    return best_div if 2 * best_div >= cap else cap


def _make_tcn_kernel(m, pad, k_taps):
    m1 = m - 2 * pad  # rows carried through both convolutions

    def tcn_kernel(x_ref, mask_ref, w1_ref, b1_ref, w2_ref, b2_ref, o_ref,
                   h_stage):
        # x_ref:    (m, Cin)   pre-padded, flattened batch tile (compute dtype)
        # mask_ref: (m1, 1)    f32 validity mask (1.0 on data rows, 0.0 on halos)
        # w1_ref:   (K, Cin, H)    b1_ref: (1, H)
        # w2_ref:   (K, H, Cout)   b2_ref: (1, Cout)
        # o_ref:    (m, Cout)  flattened padded output tile
        # h_stage:  (m, H)     VMEM scratch: padded hidden activations
        hid = h_stage.shape[1]
        cout = o_ref.shape[1]

        # ---- conv1 ('same'): K shifted (m1, Cin) @ (Cin, H) MXU matmuls ----
        acc1 = jnp.dot(x_ref[0:m1, :], w1_ref[0],
                       preferred_element_type=jnp.float32)
        for k in range(1, k_taps):
            acc1 = acc1 + jnp.dot(x_ref[k:k + m1, :], w1_ref[k],
                                  preferred_element_type=jnp.float32)

        # Bias + ReLU on all rows, validity mask zeroes the halo rows, then one
        # large sublane-aligned store into the padded hidden buffer.
        h = jnp.maximum(acc1 + b1_ref[...], 0.0) * mask_ref[...]
        h_stage[0:m1, :] = h.astype(h_stage.dtype)
        if pad > 0:
            h_stage[m1:m, :] = jnp.zeros((2 * pad, hid), h_stage.dtype)

        # ---- conv2 ('same'): K shifted (m1, H) @ (H, Cout) MXU matmuls ----
        acc2 = jnp.dot(h_stage[0:m1, :], w2_ref[0],
                       preferred_element_type=jnp.float32)
        for k in range(1, k_taps):
            acc2 = acc2 + jnp.dot(h_stage[k:k + m1, :], w2_ref[k],
                                  preferred_element_type=jnp.float32)

        # Single large aligned output store; halo rows are sliced off outside.
        o_ref[0:m1, :] = (acc2 + b2_ref[...]).astype(o_ref.dtype)
        if pad > 0:
            o_ref[m1:m, :] = jnp.zeros((2 * pad, cout), o_ref.dtype)

    return tcn_kernel


def tcn_forward(x_ncl, w1_t, b1, w2_t, b2, *,
                compute_dtype=jnp.float32, block_n=None, max_rows=2048):
    """Pallas forward pass matching torch TCN.forward.

    x_ncl: (N, Cin, L)   w1_t: (H, Cin, K)  b1: (H,)
    w2_t:  (Cout, H, K)  b2: (Cout,)
    returns: (N, Cout, L)

    compute_dtype: operand dtype for the MXU matmuls (accumulation is f32).
    jnp.bfloat16 doubles MXU rate on v6e/v7x but also stores the hidden
    activations in bf16, so keep it an explicit opt-in.
    """
    N, Cin, L = x_ncl.shape
    H, _, K = w1_t.shape
    Cout = w2_t.shape[0]
    # TODO(synk): even kernel_size with torch padding='same' pads asymmetrically;
    # only odd K (the module default, 3) is handled here.
    assert K % 2 == 1, "only odd kernel_size supported"
    pad = (K - 1) // 2

    # Per-batch segment stride, 8-row aligned.  Layout: [2*pad zeros|L data|zeros].
    S = _round_up(max(L + 3 * pad, 8), 8)

    if block_n is None:
        block_n = _pick_block_n(N, S, max_rows=max_rows)
    N_pad = _round_up(N, block_n)
    num_tiles = N_pad // block_n
    m = block_n * S
    m1 = m - 2 * pad

    # NCL -> NLC (channels on the lane axis); pad batch + sequence once in HBM.
    x_nlc = jnp.transpose(x_ncl, (0, 2, 1))  # (N, L, Cin)
    x_pad = jnp.pad(x_nlc, ((0, N_pad - N), (2 * pad, S - L - 2 * pad), (0, 0)))
    x_flat = x_pad.reshape(N_pad * S, Cin).astype(compute_dtype)

    # Validity mask over the m1 carried rows (same for every grid step):
    # hidden row r holds data iff pad <= (r mod S) < pad + L.
    seg_pos = jnp.arange(m1, dtype=jnp.int32) % S
    mask = ((seg_pos >= pad) & (seg_pos < pad + L)).astype(jnp.float32)[:, None]

    # torch weight (O, I, K) -> kernel layout (K, I, O), cast once.
    w1 = jnp.transpose(w1_t, (2, 1, 0)).astype(compute_dtype)  # (K, Cin, H)
    w2 = jnp.transpose(w2_t, (2, 1, 0)).astype(compute_dtype)  # (K, H, Cout)
    b1_2d = b1[None, :].astype(jnp.float32)                    # (1, H)
    b2_2d = b2[None, :].astype(jnp.float32)                    # (1, Cout)

    kernel = _make_tcn_kernel(m, pad, K)

    out_flat = pl.pallas_call(
        kernel,
        out_shape=jax.ShapeDtypeStruct((N_pad * S, Cout), x_ncl.dtype),
        grid_spec=pltpu.PrefetchScalarGridSpec(
            num_scalar_prefetch=0,
            grid=(num_tiles,),
            in_specs=[
                pl.BlockSpec((m, Cin), lambda i: (i, 0)),
                pl.BlockSpec((m1, 1), lambda i: (0, 0)),
                pl.BlockSpec((K, Cin, H), lambda i: (0, 0, 0)),
                pl.BlockSpec((1, H), lambda i: (0, 0)),
                pl.BlockSpec((K, H, Cout), lambda i: (0, 0, 0)),
                pl.BlockSpec((1, Cout), lambda i: (0, 0)),
            ],
            out_specs=pl.BlockSpec((m, Cout), lambda i: (i, 0)),
            scratch_shapes=[pltpu.VMEM((m, H), compute_dtype)],
        ),
        compiler_params=pltpu.CompilerParams(
            dimension_semantics=("parallel",),
            vmem_limit_bytes=32 * 1024 * 1024,
        ),
    )(x_flat, mask, w1, b1_2d, w2, b2_2d)

    out = out_flat.reshape(N_pad, S, Cout)[:N, :L, :]   # drop halos / pad batches
    return jnp.transpose(out, (0, 2, 1))                # back to NCL


def tcn_reference(x_ncl, w1_t, b1, w2_t, b2):
    """Pure-JAX reference replicating torch Conv1d(padding='same') semantics."""
    def conv1d_same(x, w, b):
        K = w.shape[-1]
        pad = (K - 1) // 2
        L = x.shape[-1]
        xp = jnp.pad(x, ((0, 0), (0, 0), (pad, pad)))
        out = jnp.zeros((x.shape[0], w.shape[0], L), jnp.float32)
        for k in range(K):
            out = out + jnp.einsum('ncl,oc->nol', xp[:, :, k:k + L], w[:, :, k])
        return out + b[None, :, None]

    h = jax.nn.relu(conv1d_same(x_ncl, w1_t, b1))
    return conv1d_same(h, w2_t, b2)


if __name__ == "__main__":
    # Shapes consistent with the module's forward: (batch, input_size, seq_len)
    N, Cin, L = 2, 4, 16
    H, Cout, K = 32, 8, 3

    key = jax.random.PRNGKey(0)
    kx, k1, kb1, k2, kb2 = jax.random.split(key, 5)

    x = jax.random.normal(kx, (N, Cin, L), dtype=jnp.float32)

    # Conv1d-style init (uniform in +/- 1/sqrt(fan_in * K))
    bound1 = 1.0 / (Cin * K) ** 0.5
    w1 = jax.random.uniform(k1, (H, Cin, K), jnp.float32, -bound1, bound1)
    b1 = jax.random.uniform(kb1, (H,), jnp.float32, -bound1, bound1)

    bound2 = 1.0 / (H * K) ** 0.5
    w2 = jax.random.uniform(k2, (Cout, H, K), jnp.float32, -bound2, bound2)
    b2 = jax.random.uniform(kb2, (Cout,), jnp.float32, -bound2, bound2)

    out = tcn_forward(x, w1, b1, w2, b2)
    out = jax.block_until_ready(out)

    ref = tcn_reference(x, w1, b1, w2, b2)
    assert out.shape == (N, Cout, L), out.shape
    assert jnp.allclose(out, ref, rtol=1e-4, atol=1e-4), (
        "mismatch: max abs diff = %e" % float(jnp.max(jnp.abs(out - ref)))
    )

    print("KERNEL_OK")
</pallas_src>

<mosaic_0001>
module attributes {stable_mosaic.version = 11 : i64} {
  func.func @tcn_kernel(%arg0: i32, %arg1: memref<48x4xf32, #tpu.memory_space<vmem>>, %arg2: memref<46x1xf32, #tpu.memory_space<vmem>>, %arg3: memref<3x4x32xf32, #tpu.memory_space<vmem>>, %arg4: memref<1x32xf32, #tpu.memory_space<vmem>>, %arg5: memref<3x32x8xf32, #tpu.memory_space<vmem>>, %arg6: memref<1x8xf32, #tpu.memory_space<vmem>>, %arg7: memref<48x8xf32, #tpu.memory_space<vmem>>, %arg8: memref<48x32xf32, #tpu.memory_space<vmem>>) attributes {dimension_semantics = [#tpu.dimension_semantics<parallel>], iteration_bounds = array<i64: 1>, scalar_prefetch = 0 : i64, scratch_operands = 1 : i64, tpu.core_type = #tpu.core_type<tc>, window_params = [{transform_indices = @transform_0, window_bounds = array<i64: 48, 4>}, {pipeline_mode = #tpu.pipeline_mode<synchronous>, transform_indices = @transform_1, window_bounds = array<i64: 46, 1>}, {pipeline_mode = #tpu.pipeline_mode<synchronous>, transform_indices = @transform_2, window_bounds = array<i64: 3, 4, 32>}, {pipeline_mode = #tpu.pipeline_mode<synchronous>, transform_indices = @transform_3, window_bounds = array<i64: 1, 32>}, {pipeline_mode = #tpu.pipeline_mode<synchronous>, transform_indices = @transform_4, window_bounds = array<i64: 3, 32, 8>}, {pipeline_mode = #tpu.pipeline_mode<synchronous>, transform_indices = @transform_5, window_bounds = array<i64: 1, 8>}, {transform_indices = @transform_6, window_bounds = array<i64: 48, 8>}]} {
    %c0 = arith.constant 0 : index
    %c0_0 = arith.constant 0 : index
    %0 = vector.load %arg1[%c0, %c0_0] : memref<48x4xf32, #tpu.memory_space<vmem>>, vector<46x4xf32>
    %c0_1 = arith.constant 0 : index
    %c0_2 = arith.constant 0 : index
    %c0_3 = arith.constant 0 : index
    %1 = vector.load %arg3[%c0_1, %c0_2, %c0_3] : memref<3x4x32xf32, #tpu.memory_space<vmem>>, vector<1x4x32xf32>
    %2 = vector.shape_cast %1 : vector<1x4x32xf32> to vector<4x32xf32>
    %cst = arith.constant dense<0.000000e+00> : vector<46x32xf32>
    %3 = tpu.matmul %0, %2, %cst {dimension_numbers = #tpu.dot_dimension_numbers<[1], [0], [0], [1], [0, 0, 1, 1], [], []>} : vector<46x4xf32>, vector<4x32xf32>, vector<46x32xf32> -> vector<46x32xf32>
    %c1 = arith.constant 1 : index
    %c0_4 = arith.constant 0 : index
    %4 = vector.load %arg1[%c1, %c0_4] : memref<48x4xf32, #tpu.memory_space<vmem>>, vector<46x4xf32>
    %c1_5 = arith.constant 1 : index
    %c0_6 = arith.constant 0 : index
    %c0_7 = arith.constant 0 : index
    %5 = vector.load %arg3[%c1_5, %c0_6, %c0_7] : memref<3x4x32xf32, #tpu.memory_space<vmem>>, vector<1x4x32xf32>
    %6 = vector.shape_cast %5 : vector<1x4x32xf32> to vector<4x32xf32>
    %cst_8 = arith.constant dense<0.000000e+00> : vector<46x32xf32>
    %7 = tpu.matmul %4, %6, %cst_8 {dimension_numbers = #tpu.dot_dimension_numbers<[1], [0], [0], [1], [0, 0, 1, 1], [], []>} : vector<46x4xf32>, vector<4x32xf32>, vector<46x32xf32> -> vector<46x32xf32>
    %8 = arith.addf %3, %7 : vector<46x32xf32>
    %c2 = arith.constant 2 : index
    %c0_9 = arith.constant 0 : index
    %9 = vector.load %arg1[%c2, %c0_9] : memref<48x4xf32, #tpu.memory_space<vmem>>, vector<46x4xf32>
    %c2_10 = arith.constant 2 : index
    %c0_11 = arith.constant 0 : index
    %c0_12 = arith.constant 0 : index
    %10 = vector.load %arg3[%c2_10, %c0_11, %c0_12] : memref<3x4x32xf32, #tpu.memory_space<vmem>>, vector<1x4x32xf32>
    %11 = vector.shape_cast %10 : vector<1x4x32xf32> to vector<4x32xf32>
    %cst_13 = arith.constant dense<0.000000e+00> : vector<46x32xf32>
    %12 = tpu.matmul %9, %11, %cst_13 {dimension_numbers = #tpu.dot_dimension_numbers<[1], [0], [0], [1], [0, 0, 1, 1], [], []>} : vector<46x4xf32>, vector<4x32xf32>, vector<46x32xf32> -> vector<46x32xf32>
    %13 = arith.addf %8, %12 : vector<46x32xf32>
    %c0_14 = arith.constant 0 : index
    %c0_15 = arith.constant 0 : index
    %14 = vector.load %arg4[%c0_14, %c0_15] : memref<1x32xf32, #tpu.memory_space<vmem>>, vector<1x32xf32>
    %15 = vector.broadcast %14 : vector<1x32xf32> to vector<46x32xf32>
    %16 = arith.addf %13, %15 : vector<46x32xf32>
    %cst_16 = arith.constant 0.000000e+00 : f32
    %17 = vector.broadcast %cst_16 : f32 to vector<46x32xf32>
    %18 = arith.maximumf %16, %17 : vector<46x32xf32>
    %c0_17 = arith.constant 0 : index
    %c0_18 = arith.constant 0 : index
    %19 = vector.load %arg2[%c0_17, %c0_18] : memref<46x1xf32, #tpu.memory_space<vmem>>, vector<46x1xf32>
    %20 = vector.broadcast %19 : vector<46x1xf32> to vector<46x32xf32>
    %21 = arith.mulf %18, %20 : vector<46x32xf32>
    %c0_19 = arith.constant 0 : index
    %c0_20 = arith.constant 0 : index
    %22 = vector.load %arg8[%c0_19, %c0_20] : memref<48x32xf32, #tpu.memory_space<vmem>>, vector<46x32xf32>
    tpu.vector_store %arg8[%c0_19, %c0_20], %21 {strides = array<i32>} : memref<48x32xf32, #tpu.memory_space<vmem>>, vector<46x32xf32>,
    %cst_21 = arith.constant 0.000000e+00 : f32
    %23 = vector.broadcast %cst_21 : f32 to vector<2x32xf32>
    %c46 = arith.constant 46 : index
    %c0_22 = arith.constant 0 : index
    %24 = vector.load %arg8[%c46, %c0_22] : memref<48x32xf32, #tpu.memory_space<vmem>>, vector<2x32xf32>
    tpu.vector_store %arg8[%c46, %c0_22], %23 {strides = array<i32>} : memref<48x32xf32, #tpu.memory_space<vmem>>, vector<2x32xf32>,
    %c0_23 = arith.constant 0 : index
    %c0_24 = arith.constant 0 : index
    %25 = vector.load %arg8[%c0_23, %c0_24] : memref<48x32xf32, #tpu.memory_space<vmem>>, vector<46x32xf32>
    %c0_25 = arith.constant 0 : index
    %c0_26 = arith.constant 0 : index
    %c0_27 = arith.constant 0 : index
    %26 = vector.load %arg5[%c0_25, %c0_26, %c0_27] : memref<3x32x8xf32, #tpu.memory_space<vmem>>, vector<1x32x8xf32>
    %27 = vector.shape_cast %26 : vector<1x32x8xf32> to vector<32x8xf32>
    %cst_28 = arith.constant dense<0.000000e+00> : vector<46x8xf32>
    %28 = tpu.matmul %25, %27, %cst_28 {dimension_numbers = #tpu.dot_dimension_numbers<[1], [0], [0], [1], [0, 0, 1, 1], [], []>} : vector<46x32xf32>, vector<32x8xf32>, vector<46x8xf32> -> vector<46x8xf32>
    %c1_29 = arith.constant 1 : index
    %c0_30 = arith.constant 0 : index
    %29 = vector.load %arg8[%c1_29, %c0_30] : memref<48x32xf32, #tpu.memory_space<vmem>>, vector<46x32xf32>
    %c1_31 = arith.constant 1 : index
    %c0_32 = arith.constant 0 : index
    %c0_33 = arith.constant 0 : index
    %30 = vector.load %arg5[%c1_31, %c0_32, %c0_33] : memref<3x32x8xf32, #tpu.memory_space<vmem>>, vector<1x32x8xf32>
    %31 = vector.shape_cast %30 : vector<1x32x8xf32> to vector<32x8xf32>
    %cst_34 = arith.constant dense<0.000000e+00> : vector<46x8xf32>
    %32 = tpu.matmul %29, %31, %cst_34 {dimension_numbers = #tpu.dot_dimension_numbers<[1], [0], [0], [1], [0, 0, 1, 1], [], []>} : vector<46x32xf32>, vector<32x8xf32>, vector<46x8xf32> -> vector<46x8xf32>
    %33 = arith.addf %28, %32 : vector<46x8xf32>
    %c2_35 = arith.constant 2 : index
    %c0_36 = arith.constant 0 : index
    %34 = vector.load %arg8[%c2_35, %c0_36] : memref<48x32xf32, #tpu.memory_space<vmem>>, vector<46x32xf32>
    %c2_37 = arith.constant 2 : index
    %c0_38 = arith.constant 0 : index
    %c0_39 = arith.constant 0 : index
    %35 = vector.load %arg5[%c2_37, %c0_38, %c0_39] : memref<3x32x8xf32, #tpu.memory_space<vmem>>, vector<1x32x8xf32>
    %36 = vector.shape_cast %35 : vector<1x32x8xf32> to vector<32x8xf32>
    %cst_40 = arith.constant dense<0.000000e+00> : vector<46x8xf32>
    %37 = tpu.matmul %34, %36, %cst_40 {dimension_numbers = #tpu.dot_dimension_numbers<[1], [0], [0], [1], [0, 0, 1, 1], [], []>} : vector<46x32xf32>, vector<32x8xf32>, vector<46x8xf32> -> vector<46x8xf32>
    %38 = arith.addf %33, %37 : vector<46x8xf32>
    %c0_41 = arith.constant 0 : index
    %c0_42 = arith.constant 0 : index
    %39 = vector.load %arg6[%c0_41, %c0_42] : memref<1x8xf32, #tpu.memory_space<vmem>>, vector<1x8xf32>
    %40 = vector.broadcast %39 : vector<1x8xf32> to vector<46x8xf32>
    %41 = arith.addf %38, %40 : vector<46x8xf32>
    %c0_43 = arith.constant 0 : index
    %c0_44 = arith.constant 0 : index
    %42 = vector.load %arg7[%c0_43, %c0_44] : memref<48x8xf32, #tpu.memory_space<vmem>>, vector<46x8xf32>
    tpu.vector_store %arg7[%c0_43, %c0_44], %41 {strides = array<i32>} : memref<48x8xf32, #tpu.memory_space<vmem>>, vector<46x8xf32>,
    %cst_45 = arith.constant 0.000000e+00 : f32
    %43 = vector.broadcast %cst_45 : f32 to vector<2x8xf32>
    %c46_46 = arith.constant 46 : index
    %c0_47 = arith.constant 0 : index
    %44 = vector.load %arg7[%c46_46, %c0_47] : memref<48x8xf32, #tpu.memory_space<vmem>>, vector<2x8xf32>
    tpu.vector_store %arg7[%c46_46, %c0_47], %43 {strides = array<i32>} : memref<48x8xf32, #tpu.memory_space<vmem>>, vector<2x8xf32>,
    return
  }
  func.func @transform_0(%arg0: i32) -> (i32, i32) {
    %c0_i32 = arith.constant 0 : i32
    %c0_i32_0 = arith.constant 0 : i32
    return %arg0, %c0_i32 : i32, i32
  }
  func.func @transform_1(%arg0: i32) -> (i32, i32) {
    %c0_i32 = arith.constant 0 : i32
    %c0_i32_0 = arith.constant 0 : i32
    %c0_i32_1 = arith.constant 0 : i32
    return %c0_i32, %c0_i32_0 : i32, i32
  }
  func.func @transform_2(%arg0: i32) -> (i32, i32, i32) {
    %c0_i32 = arith.constant 0 : i32
    %c0_i32_0 = arith.constant 0 : i32
    %c0_i32_1 = arith.constant 0 : i32
    %c0_i32_2 = arith.constant 0 : i32
    return %c0_i32, %c0_i32_0, %c0_i32_1 : i32, i32, i32
  }
  func.func @transform_3(%arg0: i32) -> (i32, i32) {
    %c0_i32 = arith.constant 0 : i32
    %c0_i32_0 = arith.constant 0 : i32
    %c0_i32_1 = arith.constant 0 : i32
    return %c0_i32, %c0_i32_0 : i32, i32
  }
  func.func @transform_4(%arg0: i32) -> (i32, i32, i32) {
    %c0_i32 = arith.constant 0 : i32
    %c0_i32_0 = arith.constant 0 : i32
    %c0_i32_1 = arith.constant 0 : i32
    %c0_i32_2 = arith.constant 0 : i32
    return %c0_i32, %c0_i32_0, %c0_i32_1 : i32, i32, i32
  }
  func.func @transform_5(%arg0: i32) -> (i32, i32) {
    %c0_i32 = arith.constant 0 : i32
    %c0_i32_0 = arith.constant 0 : i32
    %c0_i32_1 = arith.constant 0 : i32
    return %c0_i32, %c0_i32_0 : i32, i32
  }
  func.func @transform_6(%arg0: i32) -> (i32, i32) {
    %c0_i32 = arith.constant 0 : i32
    %c0_i32_0 = arith.constant 0 : i32
    return %arg0, %c0_i32 : i32, i32
  }
}

</mosaic_0001>

<bundles_post_ra>
// kernel: tpu_custom_call.1
= control target key start
LH: loop header
LB: loop body
LE: loop exit
PB: predicated region body
PF: predicated region fallthrough
CT: control target
= control target key end

     0   :  { %vm57_vm0 = vcmask 1043456   ;;  %vm38_vm1 = vcmask 31744   ;;  %v569_v7 = vmov 0   ;;  %vm280_vm2 = vcmask 261120   ;;  %s820_s2 = inlined_call_operand.vmem [shape: f32[3,4,32], index: 2, kind: input, shape index: {}]   ;;  %s821_s0 = inlined_call_operand.vmem [shape: f32[48,4], index: 0, kind: input, shape index: {}]   ;;  %s822_s1 = inlined_call_operand.vmem [shape: f32[46,1], index: 1, kind: input, shape index: {}]   ;;  %s823_s3 = inlined_call_operand.vmem [shape: f32[1,32], index: 3, kind: input, shape index: {}]   ;;  %s824_s4 = inlined_call_operand.vmem [shape: f32[3,32,8], index: 4, kind: input, shape index: {}]   ;;  %s825_s5 = inlined_call_operand.vmem [shape: f32[1,8], index: 5, kind: input, shape index: {}]   ;;  %s826_s6 = inlined_call_operand.vmem [shape: f32[48,8], index: 6, kind: output, shape index: {}]  }
   0x1   :  { %v511_v0 = vld [vmem:[%s820_s2 + $0x4] sm:$0xf]  ;;  %v29_v1 = vld [vmem:[%s820_s2] sm:$0xf]  ;;  %v26_v3 = vld [vmem:[%s821_s0 + $0x18] sm:$0xff]  ;;  %564 = vset.pattern.permute.xlu0 %v569_v7  ;;  %565 = vset.pattern.permute.xlu1 %v569_v7  ;;  %vm288_vm3 = vcmask 254976  }
   0x2   :  { %v33_v2 = vld [vmem:[%s821_s0 + $0x19] sm:$0xff]  ;;  %560 = vmatpush.msk.msra.mxu2 %vm57_vm0, %v511_v0  ;;  %561 = vmatpush.msk.msra.mxu3 %vm57_vm0, %v29_v1  ;;  %v526_v4 = vld [vmem:[%s820_s2 + $0x8] sm:$0xf]  ;;  %v32_v16 = vld [vmem:[%s821_s0 + $0x11] sm:$0xff]  ;;  %vm286_vm4 = vcmask 259072   ;;  %vm505_vm5 = vcmask 58368  }
   0x3   :  { %516 = vmatmul.msk.f32.vlgmr.msra.gmra.mxu2 %vm38_vm1, %v33_v2  ;;  %523 = vmatmul.msk.f32.vlgmr.msra.gmra.mxu3 %vm38_vm1, %v26_v3  ;;  %v30_v5 = vld [vmem:[%s821_s0 + $0x1] sm:$0xff]  ;;  %v31_v11 = vld [vmem:[%s821_s0 + $0x9] sm:$0xff]  ;;  %v241_v20 = vld [vmem:[%s822_s1 + $0x18] sm:$0xff]  ;;  %vm497_vm6 = vcmask 64512   ;;  %vm503_vm7 = vcmask 62464  }
   0x4   :  { %527 = vmatpush.msk.msrb.mxu2 %vm57_vm0, %v526_v4  ;;  %512 = vmatpush.msk.msra.mxu0 %vm57_vm0, %v511_v0  ;;  %v23_v6 = vld [vmem:[%s821_s0] sm:$0xff]  ;;  %v24_v12 = vld [vmem:[%s821_s0 + $0x8] sm:$0xff]  ;;  %v25_v17 = vld [vmem:[%s821_s0 + $0x10] sm:$0xff] }
   0x5   :  { %519 = vmatpush.msk.msra.mxu1 %vm57_vm0, %v29_v1  ;;  %513 = vmatmul.msk.f32.vlgmr.msra.gmra.mxu0 %vm38_vm1, %v30_v5  ;;  %v238_v8 = vld [vmem:[%s822_s1] sm:$0xff]  ;;  %v239_v13 = vld [vmem:[%s822_s1 + $0x8] sm:$0xff]  ;;  %v240_v18 = vld [vmem:[%s822_s1 + $0x10] sm:$0xff]  ;;  %v570_v5 = vmov 0.0  }
   0x6   :  { %520 = vmatmul.msk.f32.vlgmr.msra.gmra.mxu1 %vm38_vm1, %v23_v6  ;;  %246 = vperm.xlu0 %564, %v238_v8   ;;  %v34_v9 = vld [vmem:[%s821_s0 + $0x21] sm:$0xff]  ;;  %v35_v14 = vld [vmem:[%s821_s0 + $0x29] sm:$0x3f]  ;;  %v154_v23 = vld [vmem:[%s821_s0 + $0x12] sm:$0xff]  ;;  %289 = vst.msk [vmem:[#allocation2 + $0x2e] sm:$0x3] %vm288_vm3, %v570_v5 }
   0x7   :  { %v27_v10 = vld [vmem:[%s821_s0 + $0x20] sm:$0xff]  ;;  %566 = vset.pattern.permute.xlu2 %v569_v7  ;;  %v28_v15 = vld [vmem:[%s821_s0 + $0x28] sm:$0x3f]  ;;  %256 = vperm.xlu1 %565, %v240_v18   ;;  %v537_v29 = vld [vmem:[%s824_s4 + $0x38] sm:$0xff]  ;;  %506 = vst.msk [vmem:[%s826_s6 + $0x2e] sm:$0x3] %vm505_vm5, %v570_v5 }
   0x8   :  { %v152_v19 = vld [vmem:[%s821_s0 + $0x2] sm:$0xff]  ;;  %v153_v21 = vld [vmem:[%s821_s0 + $0xa] sm:$0xff]  ;;  %v155_v25 = vld [vmem:[%s821_s0 + $0x1a] sm:$0xff]  ;;  %341 = vmatpush.msrb.mxu3 %v537_v29 }
   0x9   :  { %v242_v22 = vld [vmem:[%s822_s1 + $0x20] sm:$0xff]  ;;  %v243_v24 = vld [vmem:[%s822_s1 + $0x28] sm:$0x3f]  ;;  %v536_v30 = vld [vmem:[%s824_s4 + $0x30] sm:$0xff] }
   0xa   :  { %266 = vperm.xlu2 %566, %v242_v22   ;;  %v156_v26 = vld [vmem:[%s821_s0 + $0x22] sm:$0xff]  ;;  %v157_v27 = vld [vmem:[%s821_s0 + $0x2a] sm:$0x3f]  ;;  %v299_v31 = vld [vmem:[%s824_s4 + $0x18] sm:$0xff]  ;;  %342 = vmatpush.msrb.mxu3 %v536_v30 }
   0xb   :  { %517 = vmatmul.msk.f32.gmra.mxu2 %vm38_vm1, %v34_v9  ;;  %524 = vmatmul.msk.f32.gmra.mxu3 %vm38_vm1, %v27_v10  ;;  %v298_v32 = vld [vmem:[%s824_s4 + $0x10] sm:$0xff]  ;;  %v297_v33 = vld [vmem:[%s824_s4 + $0x8] sm:$0xff]  ;;  %v296_v34 = vld [vmem:[%s824_s4] sm:$0xff] }
   0xc   :  { %394 = vmatpush.msrb.mxu0 %v299_v31  ;;  %v553_v36 = vld [vmem:[%s824_s4 + $0x58] sm:$0xff]  ;;  %v535_v37 = vld [vmem:[%s824_s4 + $0x28] sm:$0xff]  ;;  %v552_v38 = vld [vmem:[%s824_s4 + $0x50] sm:$0xff] }
   0xd   :  { %514 = vmatmul.msk.f32.gmra.mxu0 %vm38_vm1, %v31_v11  ;;  %458 = vmatpush.msrb.mxu1 %v553_v36  ;;  %v551_v40 = vld [vmem:[%s824_s4 + $0x48] sm:$0xff]  ;;  %v534_v42 = vld [vmem:[%s824_s4 + $0x20] sm:$0xff] }
   0xe   :  { %521 = vmatmul.msk.f32.gmra.mxu1 %vm38_vm1, %v24_v12  ;;  %251 = vperm.xlu0 %564, %v239_v13   ;;  %v550_v43 = vld [vmem:[%s824_s4 + $0x40] sm:$0xff] }
   0xf   :  { %261 = vperm.xlu1 %565, %v241_v20   ;;  %395 = vmatpush.msrb.mxu0 %v298_v32  ;;  %v755_v46 = vld [vmem:[%s823_s3] ss:$0 sm:$0xff] }
  0x10   :  { %343 = vmatpush.msrb.mxu3 %v535_v37  ;;  %459 = vmatpush.msrb.mxu1 %v552_v38 }
  0x11   :  { %396 = vmatpush.msrb.mxu0 %v297_v33 }
  0x12   :  { %271 = vperm.xlu2 %566, %v243_v24   ;;  %460 = vmatpush.msrb.mxu1 %v551_v40 }
  0x13   :  { %518 = vmatmul.msk.f32.gmra.mxu2 %vm38_vm1, %v35_v14  ;;  %525 = vmatmul.msk.f32.gmra.mxu3 %vm38_vm1, %v28_v15 }
  0x14   :  { %397 = vmatpush.msrb.mxu0 %v296_v34  ;;  %344 = vmatpush.msrb.mxu3 %v534_v42 }
  0x15   :  { %515 = vmatmul.msk.f32.gmra.mxu0 %vm38_vm1, %v32_v16  ;;  %461 = vmatpush.msrb.mxu1 %v550_v43 }
  0x16   :  { %522 = vmatmul.msk.f32.gmra.mxu1 %vm38_vm1, %v25_v17 }
  0x1b   :  { %528 = vmatmul.msk.f32.vlgmr.msrb.gmra.mxu2 %vm38_vm1, %v152_v19 }
  0x23   :  { %529 = vmatmul.msk.f32.gmra.mxu2 %vm38_vm1, %v153_v21 }
  0x2b   :  { %530 = vmatmul.msk.f32.gmra.mxu2 %vm38_vm1, %v154_v23 }
  0x33   :  { %531 = vmatmul.msk.f32.gmra.mxu2 %vm38_vm1, %v155_v25 }
  0x3b   :  { %532 = vmatmul.msk.f32.gmra.mxu2 %vm38_vm1, %v156_v26 }
  0x43   :  { %533 = vmatmul.msk.f32.gmra.mxu2 %vm38_vm1, %v157_v27 }
  0x64   :  { %v267_v29 = vpop.permute.xlu2 %266 }
  0x6c   :  { %v272_v40 = vpop.permute.xlu2 %271 }
  0x78   :  { %v247_v52 = vpop.permute.xlu0 %246 }
  0x79   :  { %v257_v7 = vpop.permute.xlu1 %256 }
  0x80   :  { %v252_v63 = vpop.permute.xlu0 %251 }
  0x81   :  { %v262_v19 = vpop.permute.xlu1 %261 }
  0x82   :  { %v78_v39 = vpop.f32.mrf.mxu0 }
  0x83   :  { %v134_v41 = vpop.f32.mrf.mxu1 }
  0x84   :  { %v135_v45 = vadd.f32 %v134_v41, %v78_v39 }
  0x86   :  { %v710_v28 = vpop.f32.mrf.mxu2  ;;  %v143_v1 = vpop.f32.mrf.mxu3 }
  0x87   :  { %v144_v9 = vadd.f32 %v143_v1, %v710_v28 }
  0x8a   :  { %v81_v47 = vpop.f32.mrf.mxu0 }
  0x8b   :  { %v137_v49 = vpop.f32.mrf.mxu1 }
  0x8c   :  { %v138_v54 = vadd.f32 %v137_v49, %v81_v47 }
  0x8e   :  { %v730_v35 = vpop.f32.mrf.mxu2  ;;  %v146_v16 = vpop.f32.mrf.mxu3 }
  0x8f   :  { %v147_v20 = vadd.f32 %v146_v16, %v730_v35 }
  0x92   :  { %v84_v58 = vpop.f32.mrf.mxu0 }
  0x93   :  { %v140_v59 = vpop.f32.mrf.mxu1 }
  0x94   :  { %v141_v62 = vadd.f32 %v140_v59, %v84_v58 }
  0x96   :  { %v750_v44 = vpop.f32.mrf.mxu2  ;;  %v149_v28 = vpop.f32.mrf.mxu3 }
  0x97   :  { %v150_v31 = vadd.f32 %v149_v28, %v750_v44 }
  0x9e   :  { %v198_v48 = vpop.f32.mrf.mxu2 }
  0x9f   :  { %v216_v50 = vadd.f32 %v198_v48, %v135_v45 }
  0xa1   :  { %v226_v51 = vadd.f32 %v755_v46, %v216_v50 }
  0xa3   :  { %v232_v53 = vmax.f32 %v226_v51, 0.0 }
  0xa5   :  { %v274_v55 = vmul.f32 %v247_v52, %v232_v53 }
  0xa6   :  { %v201_v56 = vpop.f32.mrf.mxu2 }
  0xa7   :  { %281 = vst.msk [vmem:[#allocation2] sm:$0xff] %vm280_vm2, %v274_v55  ;;  %v217_v57 = vadd.f32 %v201_v56, %v138_v54  ;;  %v568_v55 = vld [vmem:[%s825_s5] ss:$0 sm:$0xff] }
  0xa9   :  { %v227_v60 = vadd.f32 %v755_v46, %v217_v57 }
  0xab   :  { %v233_v61 = vmax.f32 %v227_v60, 0.0 }
  0xad   :  { %v275_v0 = vmul.f32 %v252_v63, %v233_v61 }
  0xae   :  { %v204_v2 = vpop.f32.mrf.mxu2  ;;  %v290_v3 = vld [vmem:[#allocation2] sm:$0xff] }
  0xaf   :  { %282 = vst.msk [vmem:[#allocation2 + $0x8] sm:$0xff] %vm280_vm2, %v275_v0  ;;  %v218_v4 = vadd.f32 %v204_v2, %v141_v62  ;;  %544 = vmatmul.msk.f32.vlgmr.msrb.gmra.mxu0 %vm280_vm2, %v290_v3 }
  0xb1   :  { %v228_v6 = vadd.f32 %v755_v46, %v218_v4 }
  0xb3   :  { %v234_v8 = vmax.f32 %v228_v6, 0.0 }
  0xb5   :  { %v276_v10 = vmul.f32 %v257_v7, %v234_v8 }
  0xb6   :  { %v207_v11 = vpop.f32.mrf.mxu2  ;;  %v300_v12 = vld [vmem:[#allocation2 + $0x1] sm:$0xff] }
  0xb7   :  { %v291_v13 = vld [vmem:[#allocation2 + $0x8] sm:$0xff]  ;;  %283 = vst.msk [vmem:[#allocation2 + $0x10] sm:$0xff] %vm280_vm2, %v276_v10  ;;  %v219_v15 = vadd.f32 %v207_v11, %v144_v9  ;;  %538 = vmatmul.msk.f32.vlgmr.msrb.gmra.mxu3 %vm280_vm2, %v300_v12 }
  0xb8   :  { %v417_v14 = vld [vmem:[#allocation2 + $0x2] sm:$0xff]  ;;  %545 = vmatmul.msk.f32.gmra.mxu0 %vm280_vm2, %v291_v13 }
  0xb9   :  { %554 = vmatmul.msk.f32.vlgmr.msrb.gmra.mxu1 %vm280_vm2, %v417_v14  ;;  %v229_v17 = vadd.f32 %v755_v46, %v219_v15 }
  0xbb   :  { %v235_v18 = vmax.f32 %v229_v17, 0.0 }
  0xbd   :  { %v277_v21 = vmul.f32 %v262_v19, %v235_v18 }
  0xbe   :  { %v210_v22 = vpop.f32.mrf.mxu2  ;;  %v301_v23 = vld [vmem:[#allocation2 + $0x9] sm:$0xff] }
  0xbf   :  { %v292_v24 = vld [vmem:[#allocation2 + $0x10] sm:$0xff]  ;;  %284 = vst.msk [vmem:[#allocation2 + $0x18] sm:$0xff] %vm280_vm2, %v277_v21  ;;  %v220_v26 = vadd.f32 %v210_v22, %v147_v20  ;;  %539 = vmatmul.msk.f32.gmra.mxu3 %vm280_vm2, %v301_v23 }
  0xc0   :  { %v418_v25 = vld [vmem:[#allocation2 + $0xa] sm:$0xff]  ;;  %546 = vmatmul.msk.f32.gmra.mxu0 %vm280_vm2, %v292_v24 }
  0xc1   :  { %555 = vmatmul.msk.f32.gmra.mxu1 %vm280_vm2, %v418_v25  ;;  %v230_v27 = vadd.f32 %v755_v46, %v220_v26 }
  0xc3   :  { %v236_v30 = vmax.f32 %v230_v27, 0.0 }
  0xc5   :  { %v278_v32 = vmul.f32 %v267_v29, %v236_v30 }
  0xc6   :  { %v213_v33 = vpop.f32.mrf.mxu2  ;;  %v302_v34 = vld [vmem:[#allocation2 + $0x11] sm:$0xff] }
  0xc7   :  { %v293_v35 = vld [vmem:[#allocation2 + $0x18] sm:$0xff]  ;;  %285 = vst.msk [vmem:[#allocation2 + $0x20] sm:$0xff] %vm280_vm2, %v278_v32  ;;  %v221_v37 = vadd.f32 %v213_v33, %v150_v31  ;;  %540 = vmatmul.msk.f32.gmra.mxu3 %vm280_vm2, %v302_v34 }
  0xc8   :  { %v419_v36 = vld [vmem:[#allocation2 + $0x12] sm:$0xff]  ;;  %547 = vmatmul.msk.f32.gmra.mxu0 %vm280_vm2, %v293_v35 }
  0xc9   :  { %556 = vmatmul.msk.f32.gmra.mxu1 %vm280_vm2, %v419_v36  ;;  %v231_v38 = vadd.f32 %v755_v46, %v221_v37 }
  0xcb   :  { %v237_v39 = vmax.f32 %v231_v38, 0.0 }
  0xcd   :  { %v279_v41 = vmul.f32 %v272_v40, %v237_v39 }
  0xce   :  { %v303_v42 = vld [vmem:[#allocation2 + $0x19] sm:$0xff] }
  0xcf   :  { %v294_v43 = vld [vmem:[#allocation2 + $0x20] sm:$0xff]  ;;  %287 = vst.msk [vmem:[#allocation2 + $0x28] sm:$0x3f] %vm286_vm4, %v279_v41  ;;  %541 = vmatmul.msk.f32.gmra.mxu3 %vm280_vm2, %v303_v42 }
  0xd0   :  { %v420_v44 = vld [vmem:[#allocation2 + $0x1a] sm:$0xff]  ;;  %548 = vmatmul.msk.f32.gmra.mxu0 %vm280_vm2, %v294_v43 }
  0xd1   :  { %557 = vmatmul.msk.f32.gmra.mxu1 %vm280_vm2, %v420_v44 }
  0xd6   :  { %v304_v45 = vld [vmem:[#allocation2 + $0x21] sm:$0xff]  ;;  %v305_v46 = vld [vmem:[#allocation2 + $0x29] sm:$0x3f] }
  0xd7   :  { %v295_v47 = vld [vmem:[#allocation2 + $0x28] sm:$0x3f]  ;;  %542 = vmatmul.msk.f32.gmra.mxu3 %vm280_vm2, %v304_v45 }
  0xd8   :  { %v421_v48 = vld [vmem:[#allocation2 + $0x22] sm:$0xff]  ;;  %549 = vmatmul.msk.f32.gmra.mxu0 %vm280_vm2, %v295_v47  ;;  %v422_v49 = vld [vmem:[#allocation2 + $0x2a] sm:$0x3f] }
  0xd9   :  { %558 = vmatmul.msk.f32.gmra.mxu1 %vm280_vm2, %v421_v48 }
  0xdf   :  { %543 = vmatmul.msk.f32.gmra.mxu3 %vm280_vm2, %v305_v46 }
  0xe1   :  { %559 = vmatmul.msk.f32.gmra.mxu1 %vm280_vm2, %v422_v49 }
 0x12c   :  { %v399_v50 = vpop.f32.mrf.mxu0 }
 0x135   :  { %v402_v52 = vpop.f32.mrf.mxu0 }
 0x136   :  { %v463_v51 = vpop.f32.mrf.mxu1 }
 0x13a   :  { %v346_v53 = vpop.f32.mrf.mxu3 }
 0x13b   :  { %v400_v54 = vadd.f32 %v399_v50, %v346_v53 }
 0x13d   :  { %v481_v56 = vadd.f32 %v463_v51, %v400_v54  ;;  %v405_v61 = vpop.f32.mrf.mxu0 }
 0x13e   :  { %v466_v57 = vpop.f32.mrf.mxu1 }
 0x13f   :  { %v491_v58 = vadd.f32 %v568_v55, %v481_v56 }
 0x141   :  { %498 = vst.msk [vmem:[%s826_s6] sm:$0xff] %vm497_vm6, %v491_v58 }
 0x142   :  { %v349_v59 = vpop.f32.mrf.mxu3 }
 0x143   :  { %v403_v60 = vadd.f32 %v402_v52, %v349_v59 }
 0x145   :  { %v482_v62 = vadd.f32 %v466_v57, %v403_v60  ;;  %v408_v4 = vpop.f32.mrf.mxu0 }
 0x146   :  { %v469_v63 = vpop.f32.mrf.mxu1 }
 0x147   :  { %v492_v0 = vadd.f32 %v568_v55, %v482_v62 }
 0x149   :  { %499 = vst.msk [vmem:[%s826_s6 + $0x8] sm:$0xff] %vm497_vm6, %v492_v0 }
 0x14a   :  { %v352_v1 = vpop.f32.mrf.mxu3 }
 0x14b   :  { %v406_v2 = vadd.f32 %v405_v61, %v352_v1 }
 0x14d   :  { %v483_v3 = vadd.f32 %v469_v63, %v406_v2  ;;  %v411_v11 = vpop.f32.mrf.mxu0 }
 0x14e   :  { %v472_v6 = vpop.f32.mrf.mxu1 }
 0x14f   :  { %v493_v5 = vadd.f32 %v568_v55, %v483_v3 }
 0x151   :  { %500 = vst.msk [vmem:[%s826_s6 + $0x10] sm:$0xff] %vm497_vm6, %v493_v5 }
 0x152   :  { %v355_v7 = vpop.f32.mrf.mxu3 }
 0x153   :  { %v409_v8 = vadd.f32 %v408_v4, %v355_v7 }
 0x155   :  { %v484_v9 = vadd.f32 %v472_v6, %v409_v8  ;;  %v414_v17 = vpop.f32.mrf.mxu0 }
 0x156   :  { %v475_v12 = vpop.f32.mrf.mxu1 }
 0x157   :  { %v494_v10 = vadd.f32 %v568_v55, %v484_v9 }
 0x159   :  { %501 = vst.msk [vmem:[%s826_s6 + $0x18] sm:$0xff] %vm497_vm6, %v494_v10 }
 0x15a   :  { %v358_v13 = vpop.f32.mrf.mxu3 }
 0x15b   :  { %v412_v14 = vadd.f32 %v411_v11, %v358_v13 }
 0x15d   :  { %v485_v15 = vadd.f32 %v475_v12, %v412_v14 }
 0x15e   :  { %v478_v20 = vpop.f32.mrf.mxu1 }
 0x15f   :  { %v495_v16 = vadd.f32 %v568_v55, %v485_v15 }
 0x161   :  { %502 = vst.msk [vmem:[%s826_s6 + $0x20] sm:$0xff] %vm497_vm6, %v495_v16 }
 0x162   :  { %v361_v18 = vpop.f32.mrf.mxu3 }
 0x163   :  { %v415_v19 = vadd.f32 %v414_v17, %v361_v18 }
 0x165   :  { %v486_v21 = vadd.f32 %v478_v20, %v415_v19 }
 0x167   :  { %v496_v22 = vadd.f32 %v568_v55, %v486_v21 }
 0x169   :  { %504 = vst.msk [vmem:[%s826_s6 + $0x28] sm:$0x3f] %vm503_vm7, %v496_v22 }

</bundles_post_ra>
